<compile_context>
chip_gen: v5e
topology: v5e:2x2
jax: 0.10.0
libtpu: 0.0.40
codegen_flags: <defaults>
</compile_context>

<pallas_src>
import jax
import jax.numpy as jnp
from jax import lax
from jax.experimental import pallas as pl
from jax.experimental.pallas import tpu as pltpu


def _vec_to_tril_kernel(v_ref, o_ref):
    """v_ref: (rb, 32) f32 -- 32 batch elements per row.
    o_ref: (rb, 128) f32 -- row-major flattened 2x2 matrices of those elements:
           lanes [4k .. 4k+3] of row r hold [1, 0, vec[32*r + k], 1].
    """
    v = v_ref[...]                                            # (rb, 32) f32

    # 0/1 scatter matrix S[k, 4k+2] = 1 (entries exactly representable in bf16).
    k_idx = lax.broadcasted_iota(jnp.int32, (32, 128), 0)
    l_idx = lax.broadcasted_iota(jnp.int32, (32, 128), 1)
    scat = (l_idx == 4 * k_idx + 2).astype(jnp.bfloat16)      # (32, 128)

    # Exact (<= 1 ulp) lane dilation of f32 via three bf16 MXU passes:
    # v = hi + mid + lo, every chunk exactly representable in bf16; products
    # with a 0/1 matrix accumulate exactly in f32. The MXU is otherwise idle,
    # so this is hidden under the output DMA.
    hi = v.astype(jnp.bfloat16)
    r1 = v - hi.astype(jnp.float32)
    mid = r1.astype(jnp.bfloat16)
    lo = (r1 - mid.astype(jnp.float32)).astype(jnp.bfloat16)
    spread = jnp.dot(hi, scat, preferred_element_type=jnp.float32)
    spread = spread + jnp.dot(mid, scat, preferred_element_type=jnp.float32)
    spread = spread + jnp.dot(lo, scat, preferred_element_type=jnp.float32)

    # Constant pattern [1, 0, *, 1]; kept (1, 128) so it broadcasts along
    # sublanes without materializing block-sized temporaries.
    lane = lax.broadcasted_iota(jnp.int32, (1, 128), 1)
    mod4 = lane % 4
    base = jnp.where(mod4 == 1, 0.0, 1.0).astype(jnp.float32)  # (1, 128)

    # Single full-tile, lane-dense store (no sublane-masked partial stores).
    o_ref[...] = jnp.where(mod4 == 2, spread, base)


def _round_up(x: int, m: int) -> int:
    return ((x + m - 1) // m) * m


def vector_to_triangular_matrix(vec, *, max_rows_per_block: int = 4096,
                                target_grid_steps: int = 8,
                                small_batch_threshold: int = 256):
    """Pallas equivalent of VectorToTriangularMatrix.forward (n=2)."""
    vec = jnp.asarray(vec, jnp.float32).reshape(-1)
    B = vec.shape[0]
    if B == 0:
        return jnp.zeros((0, 2, 2), jnp.float32)

    # Tiny batches: a fused XLA construction beats any pallas_call fixed cost.
    if B <= small_batch_threshold:
        L = jnp.zeros((B, 2, 2), jnp.float32)
        L = L.at[:, 0, 0].set(1.0)
        L = L.at[:, 1, 1].set(1.0)
        return L.at[:, 1, 0].set(vec)

    rows = -(-B // 32)                    # 32 batch elems (= 128 lanes) per row
    # >= target_grid_steps "parallel" steps (keeps both v7x TCs streaming);
    # rows-per-block is a multiple of 8 (sublane) and capped so one output
    # block is <= 2 MiB.
    row_block = min(max_rows_per_block,
                    max(8, _round_up(-(-rows // target_grid_steps), 8)))
    rows_pad = _round_up(rows, row_block)
    grid = rows_pad // row_block
    n_pad = rows_pad * 32

    # (B,) -> (rows_pad, 32): a pure reshape when B is block-aligned; ragged B
    # pays one small pad instead of a zeros + dynamic-update-slice pass.
    if n_pad == B:
        v2 = vec.reshape(rows_pad, 32)
    else:
        v2 = jnp.pad(vec, (0, n_pad - B)).reshape(rows_pad, 32)

    slab = pl.pallas_call(
        _vec_to_tril_kernel,
        out_shape=jax.ShapeDtypeStruct((rows_pad, 128), jnp.float32),
        grid=(grid,),
        in_specs=[pl.BlockSpec((row_block, 32), lambda i: (i, 0))],
        out_specs=pl.BlockSpec((row_block, 128), lambda i: (i, 0)),
        compiler_params=pltpu.CompilerParams(
            dimension_semantics=("parallel",),
            vmem_limit_bytes=40 * 1024 * 1024),
        cost_estimate=pl.CostEstimate(
            flops=3 * 2 * rows_pad * 32 * 128,       # three bf16 dilation dots
            transcendentals=0,
            bytes_accessed=rows_pad * (32 + 128) * 4),
    )(v2)

    # The slab already is the row-major (n_pad, 2, 2) result: free reshape.
    L = slab.reshape(n_pad, 2, 2)
    if n_pad != B:
        L = L[:B]   # only ragged B pays this (contiguous leading-dim slice)
    return L


if __name__ == "__main__":
    key = jax.random.PRNGKey(0)
    for B in (1000, 1024):   # ragged and 32-aligned batch sizes (Pallas path)
        vec = jax.random.normal(jax.random.fold_in(key, B), (B,),
                                dtype=jnp.float32)
        L = jax.block_until_ready(vector_to_triangular_matrix(vec))

        # Reference (plain JAX, mirrors the PyTorch semantics).
        L_ref = jnp.zeros((B, 2, 2), jnp.float32)
        L_ref = L_ref.at[:, 1, 0].set(vec)
        L_ref = L_ref.at[:, 0, 0].set(1.0)
        L_ref = L_ref.at[:, 1, 1].set(1.0)

        assert L.shape == (B, 2, 2) and L.dtype == jnp.float32
        assert jnp.allclose(L, L_ref, rtol=1e-6, atol=1e-7), f"mismatch at B={B}"
    print("KERNEL_OK")
</pallas_src>

<mosaic_0001>
module attributes {stable_mosaic.version = 11 : i64} {
  func.func @_vec_to_tril_kernel(%arg0: i32, %arg1: memref<8x32xf32, #tpu.memory_space<vmem>>, %arg2: memref<8x128xf32, #tpu.memory_space<vmem>>) attributes {dimension_semantics = [#tpu.dimension_semantics<parallel>], iteration_bounds = array<i64: 4>, scalar_prefetch = 0 : i64, scratch_operands = 0 : i64, tpu.core_type = #tpu.core_type<tc>, window_params = [{transform_indices = @transform_0, window_bounds = array<i64: 8, 32>}, {transform_indices = @transform_1, window_bounds = array<i64: 8, 128>}]} {
    %c0 = arith.constant 0 : index
    %c0_0 = arith.constant 0 : index
    %0 = vector.load %arg1[%c0, %c0_0] : memref<8x32xf32, #tpu.memory_space<vmem>>, vector<8x32xf32>
    %1 = tpu.iota {dimensions = array<i32: 0>} : vector<32x128xi32>
    %2 = tpu.iota {dimensions = array<i32: 1>} : vector<32x128xi32>
    %c4_i32 = arith.constant 4 : i32
    %3 = vector.broadcast %c4_i32 : i32 to vector<32x128xi32>
    %4 = arith.muli %3, %1 : vector<32x128xi32>
    %c2_i32 = arith.constant 2 : i32
    %5 = vector.broadcast %c2_i32 : i32 to vector<32x128xi32>
    %6 = arith.addi %4, %5 : vector<32x128xi32>
    %7 = arith.cmpi eq, %2, %6 : vector<32x128xi32>
    %8 = arith.extui %7 : vector<32x128xi1> to vector<32x128xi32>
    %9 = arith.sitofp %8 : vector<32x128xi32> to vector<32x128xf32>
    %10 = arith.truncf %9 : vector<32x128xf32> to vector<32x128xbf16>
    %11 = arith.truncf %0 : vector<8x32xf32> to vector<8x32xbf16>
    %12 = arith.extf %11 : vector<8x32xbf16> to vector<8x32xf32>
    %13 = arith.subf %0, %12 : vector<8x32xf32>
    %14 = arith.truncf %13 : vector<8x32xf32> to vector<8x32xbf16>
    %15 = arith.extf %14 : vector<8x32xbf16> to vector<8x32xf32>
    %16 = arith.subf %13, %15 : vector<8x32xf32>
    %17 = arith.truncf %16 : vector<8x32xf32> to vector<8x32xbf16>
    %cst = arith.constant dense<0.000000e+00> : vector<8x128xf32>
    %18 = tpu.matmul %11, %10, %cst {dimension_numbers = #tpu.dot_dimension_numbers<[1], [0], [0], [1], [0, 0, 1, 1], [], []>} : vector<8x32xbf16>, vector<32x128xbf16>, vector<8x128xf32> -> vector<8x128xf32>
    %cst_1 = arith.constant dense<0.000000e+00> : vector<8x128xf32>
    %19 = tpu.matmul %14, %10, %cst_1 {dimension_numbers = #tpu.dot_dimension_numbers<[1], [0], [0], [1], [0, 0, 1, 1], [], []>} : vector<8x32xbf16>, vector<32x128xbf16>, vector<8x128xf32> -> vector<8x128xf32>
    %20 = arith.addf %18, %19 : vector<8x128xf32>
    %cst_2 = arith.constant dense<0.000000e+00> : vector<8x128xf32>
    %21 = tpu.matmul %17, %10, %cst_2 {dimension_numbers = #tpu.dot_dimension_numbers<[1], [0], [0], [1], [0, 0, 1, 1], [], []>} : vector<8x32xbf16>, vector<32x128xbf16>, vector<8x128xf32> -> vector<8x128xf32>
    %22 = arith.addf %20, %21 : vector<8x128xf32>
    %23 = tpu.iota {dimensions = array<i32: 1>} : vector<1x128xi32>
    %c4_i32_3 = arith.constant 4 : i32
    %c0_i32 = arith.constant 0 : i32
    %24 = arith.cmpi eq, %c4_i32_3, %c0_i32 : i32
    %c1_i32 = arith.constant 1 : i32
    %25 = arith.select %24, %c1_i32, %c4_i32_3 : i32
    %26 = vector.broadcast %25 : i32 to vector<1x128xi32>
    %27 = arith.remsi %23, %26 : vector<1x128xi32>
    %c0_i32_4 = arith.constant 0 : i32
    %28 = vector.broadcast %c0_i32_4 : i32 to vector<1x128xi32>
    %29 = arith.cmpi ne, %27, %28 : vector<1x128xi32>
    %c0_i32_5 = arith.constant 0 : i32
    %30 = vector.broadcast %c0_i32_5 : i32 to vector<1x128xi32>
    %31 = arith.cmpi slt, %27, %30 : vector<1x128xi32>
    %c0_i32_6 = arith.constant 0 : i32
    %32 = arith.cmpi slt, %25, %c0_i32_6 : i32
    %33 = vector.broadcast %32 : i1 to vector<1x128xi1>
    %34 = vector.broadcast %33 : vector<1x128xi1> to vector<1x128xi1>
    %35 = arith.xori %31, %34 : vector<1x128xi1>
    %36 = arith.andi %35, %29 : vector<1x128xi1>
    %37 = vector.broadcast %25 : i32 to vector<1x128xi32>
    %38 = arith.addi %27, %37 : vector<1x128xi32>
    %39 = arith.select %36, %38, %27 : vector<1x128xi1>, vector<1x128xi32>
    %c1_i32_7 = arith.constant 1 : i32
    %40 = vector.broadcast %c1_i32_7 : i32 to vector<1x128xi32>
    %41 = arith.cmpi eq, %39, %40 : vector<1x128xi32>
    %cst_8 = arith.constant 0.000000e+00 : f32
    %cst_9 = arith.constant 1.000000e+00 : f32
    %42 = vector.broadcast %cst_8 : f32 to vector<1x128xf32>
    %43 = vector.broadcast %cst_9 : f32 to vector<1x128xf32>
    %44 = arith.select %41, %42, %43 : vector<1x128xi1>, vector<1x128xf32>
    %c2_i32_10 = arith.constant 2 : i32
    %45 = vector.broadcast %c2_i32_10 : i32 to vector<1x128xi32>
    %46 = arith.cmpi eq, %39, %45 : vector<1x128xi32>
    %47 = vector.shape_cast %46 : vector<1x128xi1> to vector<1x128xi1>
    %48 = vector.broadcast %47 : vector<1x128xi1> to vector<8x128xi1>
    %49 = vector.shape_cast %44 : vector<1x128xf32> to vector<1x128xf32>
    %50 = vector.broadcast %49 : vector<1x128xf32> to vector<8x128xf32>
    %51 = arith.select %48, %22, %50 : vector<8x128xi1>, vector<8x128xf32>
    %c0_11 = arith.constant 0 : index
    %c0_12 = arith.constant 0 : index
    %52 = vector.load %arg2[%c0_11, %c0_12] : memref<8x128xf32, #tpu.memory_space<vmem>>, vector<8x128xf32>
    tpu.vector_store %arg2[%c0_11, %c0_12], %51 {strides = array<i32>} : memref<8x128xf32, #tpu.memory_space<vmem>>, vector<8x128xf32>,
    return
  }
  func.func @transform_0(%arg0: i32) -> (i32, i32) {
    %c0_i32 = arith.constant 0 : i32
    %c0_i32_0 = arith.constant 0 : i32
    return %arg0, %c0_i32 : i32, i32
  }
  func.func @transform_1(%arg0: i32) -> (i32, i32) {
    %c0_i32 = arith.constant 0 : i32
    %c0_i32_0 = arith.constant 0 : i32
    return %arg0, %c0_i32 : i32, i32
  }
}

</mosaic_0001>

<bundles_post_ra>
// kernel: tpu_custom_call.1
= control target key start
LH: loop header
LB: loop body
LE: loop exit
PB: predicated region body
PF: predicated region fallthrough
CT: control target
= control target key end

     0   :  { %6 = vsyncpa [#allocation3], 0  ;;  %s645_s0 = inlined_call_operand.hbm [shape: f32[32,32], index: 0, kind: input, shape index: {}]   ;;  %s646_s1 = inlined_call_operand.hbm [shape: f32[32,128], index: 1, kind: output, shape index: {}]  }
   0x1   :  { %8 = vsyncpa [#allocation3 + $0x1], 0 }
   0x2   :  { %9 = vsyncpa [#allocation4], 0 }
   0x3   :  { %11 = vsyncpa [#allocation4 + $0x1], 0  ;;  %s516_s6 = smov 0   ;;  %s518_s7 = smov 0  }
   0x4   :  { %s520_s8 = smov 0   ;;  %s522_s9 = smov 0  }
   0x5 LB: > { %s537_s10 = sadd.s32 4294967295, %s502_s9   ;;  %s327_s11 = sadd.s32 4294967294, %s502_s9   ;;  %s502_s9 = sphi %s522_s9, %s655_s9   ;;  %s498_s8 = sphi %s520_s8, %s654_s8   ;;  %s494_s7 = sphi %s518_s7, %s653_s7   ;;  %s490_s6 = sphi %s516_s6, %s652_s6  }
   0x6   : > { %s541_s12 = sadd.s32 1, %s502_s9   ;;  %s24_s13 = sadd.s32 1, %s498_s8 }
   0x7   : > { %s21_s14 = ssub.s32 %s502_s9, %s541_s12  ;;  %p31_p0 = scmp.ne.s32.totalorder %s498_s8, %s494_s7 }
   0x8   : > { %p22_p1 = scmp.eq.s32.totalorder %s21_s14, 0  ;;  %p32_p2 = scmp.eq.s32.totalorder %s502_s9, 0 }
   0x9   : > { %p37_p3 = scmp.ne.s32.totalorder %s494_s7, %s490_s6  ;;  %p38_p4 = scmp.eq.s32.totalorder %s537_s10, 0 }
   0xa   : > { %s553_s15 = scalar_select %p22_p1, %s498_s8, %s24_s13  }
   0xb   : > { %p555_p5 = por %p32_p2, %p31_p0  ;;  %p559_p6 = por %p38_p4, %p37_p3 }
   0xc   : > { %p61_p7 = scmp.eq.s32.totalorder %s537_s10, 3  ;;  %p67_p8 = scmp.eq.s32.totalorder %s327_s11, 3 }
   0xd   : > { %p370_p9 = scmp.lt.s32.totalorder %s502_s9, 4  ;;  %s87_s20 = sand.u32 1, %s498_s8  }
   0xe   : > { %p565_p10 = por %p61_p7, %p31_p0  ;;  %p569_p11 = por %p67_p8, %p37_p3 }
   0xf   : > { %s331_s21 = sshll.u32 %s502_s9, 3  ;;  %s330_s22 = sshll.u32 %s87_s20, 3 }
  0x10   : > { %s95_s25 = scalar_lea.hbm %s645_s0, %s331_s21  ;;  %s91_s27 = scalar_lea.vmem [#allocation2], %s330_s22 }
  0x11   : > { %s97_s26 = sshll.u32 %s95_s25, 4  ;;  %s99_s28 = sshll.u32 %s91_s27, 4  ;;  %s98_s26 = int_to_ptr.hbm [resolvable:$true] %s97_s26  ;;  %s100_s28 = int_to_ptr.vmem [resolvable:$true] %s99_s28 }
  0x12   : > { %p580_p12 = pnand %p370_p9, %p555_p5  ;;  %p332_p13 = scmp.ge.s32.totalorder %s502_s9, 1 }
  0x13   : > { %p104_p0 = scmp.lt.s32.totalorder %s502_s9, 5  ;;  %s88_s30 = scalar_lea.sflag [#allocation3], %s87_s20 }
  0x14   : > { %s406_s2 = sshra.s32 %s98_s26, 4  ;;  %p410_p2 = pneg %p580_p12  ;;  %s407_s2 = int_to_ptr.hbm [resolvable:$true] %s406_s2 }
  0x15   : > { %s408_s3 = scalar_lea.hbm %s407_s2, 8  ;;  %s413_s11 = scalar_lea.hbm %s645_s0, 32 }
  0x16   : > { %p409_p1 = scmp.ne.s32.totalorder %s407_s2, %s408_s3  ;;  %p414_p5 = scmp.lt.s32.totalorder %s407_s2, %s645_s0 }
  0x17   : > { %p415_p7 = scmp.lt.s32.totalorder %s413_s11, %s408_s3 }
  0x18   : > { %p411_p3 = pnand %p410_p2, %p409_p1 }
  0x19   : > { %p416_p8 = por %p415_p7, %p414_p5 }
  0x1a   : > { %p412_p4 = pneg %p411_p3 }
  0x1c   : > { %p417_p9 = pnand %p416_p8, %p412_p4 }
  0x1e   : > { %420 = shalt.err (!%p417_p9)
}
  0x1f   : > { %365 = dma.hbm_to_vmem [thread:$0]  (!%p580_p12), %s98_s26, 128, %s100_s28, %s88_s30  }
  0x20   : > { %p105_p1 = pnand %p332_p13, %p104_p0 }
  0x21   : > { %s601_s16 = sand.u32 (!%p105_p1), 1, %s494_s7  }
  0x22   : > { %108 = sbr.rel (%p105_p1) target bundleno = 200 (0xc8), region = 24  ;;  %s333_s20 = sshll.u32 (!%p105_p1), %s601_s16, 3 }
  0x23   : > { %s111_s21 = scalar_lea.sflag (!%p105_p1), [#allocation3], %s601_s16  ;;  %s114_s22 = scalar_lea.vmem (!%p105_p1), [#allocation2], %s333_s20 }
  0x27   : > { %481 = dma.done.wait (%p559_p6), %s111_s21, 128  }
  0x28   : > { %483 = vsyncadd (%p559_p6), %s111_s21, 4294967168  ;;  %v136_v0 = vlaneseq  ;;  %v135_v11 = vld [vmem:[%s114_s22] sm:$0xff]  ;;  %v504_v17 = vmov 1.0|1.0   ;;  %vm172_vm6 = vcmask 261120   ;;  %s355_s17 = sshll.u32 %s537_s10, 3 }
  0x29   : > { %v165_v15 = vpack.c.bf16 %v135_v11, %v135_v11  ;;  %s252_s25 = scalar_lea.hbm %s646_s1, %s355_s17  ;;  %s133_s26 = scalar_lea.vmem [#allocation5], %s333_s20  ;;  %v505_v30 = vmov 1.0  }
  0x2a   : > { %v137_v1 = vshrl.u32 %v136_v0, 7  ;;  %v142_v6 = vand.u32 127, %v136_v0  ;;  %s254_s27 = sshll.u32 %s133_s26, 4  ;;  %s256_s28 = sshll.u32 %s252_s25, 4  ;;  %s255_s27 = int_to_ptr.vmem [resolvable:$true] %s254_s27  ;;  %s257_s28 = int_to_ptr.hbm [resolvable:$true] %s256_s28 }
  0x2b   : > { %v166_v16 = vunpack.c.l.bf16 %v165_v15  ;;  %s242_s10 = scalar_lea.sflag [#allocation4], %s601_s16  ;;  %s450_s29 = sshra.s32 %s257_s28, 4  ;;  %s451_s29 = int_to_ptr.hbm [resolvable:$true] %s450_s29 }
  0x2c   : > { %v139_v2 = vadd.s32 16, %v137_v1  ;;  %v140_v3 = vadd.s32 24, %v137_v1  ;;  %v138_v4 = vadd.s32 8, %v137_v1  ;;  %v143_v5 = vmul.u32 4, %v137_v1  ;;  %s452_s30 = scalar_lea.hbm %s451_s29, 8  ;;  %s456_s4 = scalar_lea.hbm %s646_s1, 32 }
  0x2d   : > { %v167_v18 = vsub.f32 %v135_v11, %v166_v16  ;;  %v226_v25 = vand.u32 3, %v142_v6  ;;  %p453_p6 = scmp.ne.s32.totalorder %s451_s29, %s452_s30  ;;  %p457_p0 = scmp.lt.s32.totalorder %s451_s29, %s646_s1 }
  0x2e   : > { %v145_v7 = vmul.u32 4, %v139_v2  ;;  %v146_v8 = vmul.u32 4, %v140_v3  ;;  %v144_v9 = vmul.u32 4, %v138_v4  ;;  %v147_v10 = vadd.s32 2, %v143_v5  ;;  %p458_p2 = scmp.lt.s32.totalorder %s456_s4, %s452_s30 }
  0x2f   : > { %v168_v19 = vpack.c.bf16 %v167_v18, %v167_v18  ;;  %vm234_vm7 = vcmp.eq.s32.totalorder %v226_v25, 1  ;;  %vm236_vm8 = vcmp.eq.s32.totalorder %v226_v25, 2  ;;  %p454_p12 = pnand %p453_p6, %p565_p10 }
  0x30   : > { %v149_v12 = vadd.s32 2, %v145_v7  ;;  %v150_v13 = vadd.s32 2, %v146_v8  ;;  %v148_v14 = vadd.s32 2, %v144_v9  ;;  %vm151_vm2 = vcmp.eq.s32.totalorder %v142_v6, %v147_v10  ;;  %p459_p3 = por %p458_p2, %p457_p0 }
  0x31   : > { %v169_v20 = vunpack.c.l.bf16 %v168_v19  ;;  %v235_v31 = vsel %vm234_vm7, 0.0, %v505_v30  ;;  %p455_p13 = pneg %p454_p12 }
  0x32   : > { %vm153_vm0 = vcmp.eq.s32.totalorder %v142_v6, %v149_v12  ;;  %vm154_vm1 = vcmp.eq.s32.totalorder %v142_v6, %v150_v13  ;;  %vm152_vm3 = vcmp.eq.s32.totalorder %v142_v6, %v148_v14 }
  0x33   : > { %vm339_vm4 = vmpackc.low %vm154_vm1, %vm153_vm0  ;;  %v170_v21 = vsub.f32 %v167_v18, %v169_v20  ;;  %p460_p4 = pnand %p459_p3, %p455_p13 }
  0x34   : > { %340 = vmatpush.bf16.msk.msra.mxu0 %vm339_vm4, %v504_v17  ;;  %345 = vmatpush.bf16.msk.msra.mxu1 %vm339_vm4, %v504_v17  ;;  %vm341_vm5 = vmpackc.low %vm152_vm3, %vm151_vm2 }
  0x35   : > { %350 = vmatpush.bf16.msk.msra.mxu2 %vm339_vm4, %v504_v17  ;;  %v171_v22 = vpack.c.bf16 %v170_v21, %v170_v21 }
  0x38   : > { %342 = vmatpush.bf16.msk.msra.mxu0 %vm341_vm5, %v504_v17  ;;  %347 = vmatpush.bf16.msk.msra.mxu1 %vm341_vm5, %v504_v17 }
  0x39   : > { %352 = vmatpush.bf16.msk.msra.mxu2 %vm341_vm5, %v504_v17 }
  0x3b   : > { %343 = vmatmul.msk.bf16.vlgmr.msra.gmra.mxu0 %vm172_vm6, %v168_v19  ;;  %348 = vmatmul.msk.bf16.vlgmr.msra.gmra.mxu1 %vm172_vm6, %v165_v15 }
  0x3c   : > { %353 = vmatmul.msk.bf16.vlgmr.msra.gmra.mxu2 %vm172_vm6, %v171_v22 }
  0xb8   : > { %v185_v23 = vpop.f32.mrf.mxu0  ;;  %v201_v24 = vpop.f32.mrf.mxu1 }
  0xb9   : > { %v202_v26 = vadd.f32 %v201_v24, %v185_v23 }
  0xbf   : > { %v217_v29 = vpop.f32.mrf.mxu2 }
  0xc0   : > { %v187_v27 = vpop.f32.mrf.mxu0  ;;  %v203_v28 = vpop.f32.mrf.mxu1  ;;  %v221_v32 = vadd.f32 %v217_v29, %v202_v26 }
  0xc2   : > { %v239_v33 = vsel %vm236_vm8, %v221_v32, %v235_v31 }
  0xc3   : > { %240 = vst [vmem:[%s133_s26] sm:$0xff] %v239_v33 }
  0xc4   : > { %463 = shalt.err (!%p460_p4)
}
  0xc5   : > { %360 = dma.vmem_to_hbm [thread:$0]  (%p565_p10), %s255_s27, 128, %s257_s28, %s242_s10  }
  0xc7   : > { %v219_v34 = vpop.f32.mrf.mxu2 }
  0xc8 PF: > { %p371_p5 = scmp.ge.s32.totalorder %s502_s9, 2  ;;  %s268_s13 = sand.u32 1, %s490_s6  }
  0xc9   : > { %s269_s14 = scalar_lea.sflag [#allocation4], %s268_s13 }
  0xca   : > { %p367_p7 = pnand %p371_p5, %p569_p11 }
  0xcc   : > { %p368_p8 = pneg %p367_p7 }
  0xce   : > { %485 = dma.done.wait (%p368_p8), %s269_s14, 128  }
  0xcf   : > { %487 = vsyncadd (%p368_p8), %s269_s14, 4294967168  ;;  %p14_p9 = scmp.ge.s32.totalorder %s541_s12, 6   ;;  %s652_s6 = smov %s494_s7 }
  0xd0   : > { %s653_s7 = smov %s498_s8  ;;  %s654_s8 = smov %s553_s15 }
  0xd1   : > { %s655_s9 = smov %s541_s12  ;;  %16 = sbr.rel (!%p14_p9) target bundleno = 5 (0x5), region = 69 }
  0xd6   :  { %275 = vsyncpa [#allocation3], 1 }
  0xd7   :  { %277 = vsyncpa [#allocation3 + $0x1], 1 }
  0xd8   :  { %278 = vsyncpa [#allocation4], 1 }
  0xd9   :  { %280 = vsyncpa [#allocation4 + $0x1], 1 }

</bundles_post_ra>
